<compile_context>
chip_gen: v7x
topology: tpu7x:2x2x1
jax: 0.10.0
libtpu: 0.0.40
codegen_flags: <defaults>
</compile_context>

<pallas_src>
import functools

import jax
import jax.numpy as jnp
import numpy as np
from jax.experimental import pallas as pl
from jax.experimental.pallas import tpu as pltpu


def _ensemble_critic_kernel(n_layers, mxu_dtype, xa_ref, w_ref, b_ref, q_ref):
    """xa: (E, B, Hmax) zero-padded concat([obs, act], -1)
    w:  (L, E, Hmax, Hmax) zero-padded stacked Linear weights
    b:  (L, E, 1, Hmax)    zero-padded stacked Linear biases
    q:  (E, B)
    """
    h = xa_ref[...]  # f32, zero-padded beyond obs_dim+act_dim

    # Hidden layers: batched matmul over all E members in one einsum, + bias, ReLU.
    # (Static unrolled loop: L is tiny; switch to lax.fori_loop over w_ref.at[l]
    #  if the MLP ever gets deep.)
    for l in range(n_layers - 1):
        h = jnp.einsum(
            "ebi,eio->ebo",
            h.astype(mxu_dtype),
            w_ref[l].astype(mxu_dtype),
            preferred_element_type=jnp.float32,
        ) + b_ref[l]
        h = jnp.maximum(h, 0.0)

    # Last layer: Linear(H -> 1) + squeeze(-1).  The stacked last-layer W/b are
    # zero in every padded output column, so the lane reduction over z equals
    # z[:, :, 0] == q, and q lands directly as (E, B).
    z = jnp.einsum(
        "ebi,eio->ebo",
        h.astype(mxu_dtype),
        w_ref[n_layers - 1].astype(mxu_dtype),
        preferred_element_type=jnp.float32,
    ) + b_ref[n_layers - 1]
    q_ref[...] = jnp.sum(z, axis=-1).astype(q_ref.dtype)


def ensemble_critic_forward(x, act, params, *, mxu_bf16=False):
    """x: (E, B, obs_dim), act: (E, B, act_dim),
    params: list of (W: (E, in, out), b: (E, 1, out)) per Linear layer
    (first layer's `in` == obs_dim + act_dim, last layer's `out` == 1).
    Returns q: (E, B)."""
    E, B, obs_dim = x.shape
    _, _, act_dim = act.shape
    n_layers = len(params)
    assert n_layers >= 2, "expects at least one hidden layer"
    assert params[0][0].shape[1] == obs_dim + act_dim
    assert params[-1][0].shape[-1] == 1, "last layer must have output dim 1"

    dims = [w.shape[1] for (w, _) in params] + [w.shape[2] for (w, _) in params]
    h_max = max(dims)

    # Fold torch.cat([obs, act], -1) into the wrapper; zero-pad the feature dim
    # to h_max so it matches the zero-padded stacked layer-0 weight.
    xa = jnp.concatenate([x, act], axis=-1)
    xa = jnp.pad(xa, ((0, 0), (0, 0), (0, h_max - xa.shape[-1])))
    xa = xa.astype(jnp.float32)

    # Stack all Linear weights/biases into single zero-padded arrays
    # (3 kernel operands total instead of one pair per layer).
    w_stack = jnp.zeros((n_layers, E, h_max, h_max), jnp.float32)
    b_stack = jnp.zeros((n_layers, E, 1, h_max), jnp.float32)
    for l, (w, b) in enumerate(params):
        w_stack = w_stack.at[l, :, : w.shape[1], : w.shape[2]].set(w)
        b_stack = b_stack.at[l, :, :, : b.shape[2]].set(b)

    vmem = pl.BlockSpec(memory_space=pltpu.MemorySpace.VMEM)
    mxu_dtype = jnp.bfloat16 if mxu_bf16 else jnp.float32
    kernel = functools.partial(_ensemble_critic_kernel, n_layers, mxu_dtype)

    q = pl.pallas_call(
        kernel,
        out_shape=jax.ShapeDtypeStruct((E, B), jnp.float32),
        in_specs=[vmem, vmem, vmem],
        out_specs=vmem,
    )(xa, w_stack, b_stack)
    return q


def reference_forward(x, act, params):
    """Pure-JAX reference mirroring EnsembleCritic._heads / MLPQFunction."""
    n_layers = len(params)
    qs = []
    for e in range(x.shape[0]):
        h = jnp.concatenate([x[e], act[e]], axis=-1)
        for l, (w, b) in enumerate(params):
            h = h @ w[e] + b[e]
            if l < n_layers - 1:
                h = jnp.maximum(h, 0.0)
        qs.append(h[:, 0])  # squeeze(-1)
    return jnp.stack(qs, axis=0)


if __name__ == "__main__":
    INIT_SIGMA = 0.01
    E, B = 2, 8                      # ac_number, batch
    obs_dim, act_dim = 16, 8
    hidden_sizes = (32, 32)

    key = jax.random.PRNGKey(0)

    # Stacked per-member Linear params: sizes = [obs+act] + hidden + [1].
    sizes = [obs_dim + act_dim] + list(hidden_sizes) + [1]
    params = []
    for j in range(len(sizes) - 1):
        key, kw, kb = jax.random.split(key, 3)
        w = INIT_SIGMA * jax.random.normal(kw, (E, sizes[j], sizes[j + 1]), jnp.float32)
        b = INIT_SIGMA * jax.random.normal(kb, (E, 1, sizes[j + 1]), jnp.float32)
        params.append((w, b))

    key, kx, ka = jax.random.split(key, 3)
    x = jax.random.normal(kx, (E, B, obs_dim), dtype=jnp.float32)
    act = jax.random.normal(ka, (E, B, act_dim), dtype=jnp.float32)

    q = ensemble_critic_forward(x, act, params)   # f32 MXU path (meets 1e-5 tol)
    q = jax.block_until_ready(q)

    q_ref = reference_forward(x, act, params)
    np.testing.assert_allclose(np.asarray(q), np.asarray(q_ref), rtol=1e-5, atol=1e-5)

    print("KERNEL_OK")
</pallas_src>

<mosaic_0001>
module attributes {stable_mosaic.version = 11 : i64} {
  func.func @_ensemble_critic_kernel(%arg0: memref<2x8x32xf32, #tpu.memory_space<vmem>>, %arg1: memref<3x2x32x32xf32, #tpu.memory_space<vmem>>, %arg2: memref<3x2x1x32xf32, #tpu.memory_space<vmem>>, %arg3: memref<2x8xf32, #tpu.memory_space<vmem>>) attributes {dimension_semantics = [], scalar_prefetch = 0 : i64, scratch_operands = 0 : i64, tpu.core_type = #tpu.core_type<tc>} {
    %c0 = arith.constant 0 : index
    %c0_0 = arith.constant 0 : index
    %c0_1 = arith.constant 0 : index
    %0 = vector.load %arg0[%c0, %c0_0, %c0_1] : memref<2x8x32xf32, #tpu.memory_space<vmem>>, vector<2x8x32xf32>
    %c0_2 = arith.constant 0 : index
    %c0_3 = arith.constant 0 : index
    %c0_4 = arith.constant 0 : index
    %c0_5 = arith.constant 0 : index
    %1 = vector.load %arg1[%c0_2, %c0_3, %c0_4, %c0_5] : memref<3x2x32x32xf32, #tpu.memory_space<vmem>>, vector<1x2x32x32xf32>
    %2 = vector.shape_cast %1 : vector<1x2x32x32xf32> to vector<2x32x32xf32>
    "tpu.trace_start"() <{level = 10 : i32, message = "ebi,eio->ebo"}> : () -> ()
    %cst = arith.constant dense<0.000000e+00> : vector<2x8x32xf32>
    %3 = tpu.matmul %0, %2, %cst {dimension_numbers = #tpu.dot_dimension_numbers<[2], [1], [1], [2], [0, 0, 0, 1, 1, 2], [0], [0]>} : vector<2x8x32xf32>, vector<2x32x32xf32>, vector<2x8x32xf32> -> vector<2x8x32xf32>
    "tpu.trace_stop"() : () -> ()
    %c0_6 = arith.constant 0 : index
    %c0_7 = arith.constant 0 : index
    %c0_8 = arith.constant 0 : index
    %c0_9 = arith.constant 0 : index
    %4 = vector.load %arg2[%c0_6, %c0_7, %c0_8, %c0_9] : memref<3x2x1x32xf32, #tpu.memory_space<vmem>>, vector<1x2x1x32xf32>
    %5 = vector.shape_cast %4 : vector<1x2x1x32xf32> to vector<2x1x32xf32>
    %6 = vector.broadcast %5 : vector<2x1x32xf32> to vector<2x8x32xf32>
    %7 = arith.addf %3, %6 : vector<2x8x32xf32>
    %cst_10 = arith.constant 0.000000e+00 : f32
    %8 = vector.broadcast %cst_10 : f32 to vector<2x8x32xf32>
    %9 = arith.maximumf %7, %8 : vector<2x8x32xf32>
    %c1 = arith.constant 1 : index
    %c0_11 = arith.constant 0 : index
    %c0_12 = arith.constant 0 : index
    %c0_13 = arith.constant 0 : index
    %10 = vector.load %arg1[%c1, %c0_11, %c0_12, %c0_13] : memref<3x2x32x32xf32, #tpu.memory_space<vmem>>, vector<1x2x32x32xf32>
    %11 = vector.shape_cast %10 : vector<1x2x32x32xf32> to vector<2x32x32xf32>
    "tpu.trace_start"() <{level = 10 : i32, message = "ebi,eio->ebo"}> : () -> ()
    %cst_14 = arith.constant dense<0.000000e+00> : vector<2x8x32xf32>
    %12 = tpu.matmul %9, %11, %cst_14 {dimension_numbers = #tpu.dot_dimension_numbers<[2], [1], [1], [2], [0, 0, 0, 1, 1, 2], [0], [0]>} : vector<2x8x32xf32>, vector<2x32x32xf32>, vector<2x8x32xf32> -> vector<2x8x32xf32>
    "tpu.trace_stop"() : () -> ()
    %c1_15 = arith.constant 1 : index
    %c0_16 = arith.constant 0 : index
    %c0_17 = arith.constant 0 : index
    %c0_18 = arith.constant 0 : index
    %13 = vector.load %arg2[%c1_15, %c0_16, %c0_17, %c0_18] : memref<3x2x1x32xf32, #tpu.memory_space<vmem>>, vector<1x2x1x32xf32>
    %14 = vector.shape_cast %13 : vector<1x2x1x32xf32> to vector<2x1x32xf32>
    %15 = vector.broadcast %14 : vector<2x1x32xf32> to vector<2x8x32xf32>
    %16 = arith.addf %12, %15 : vector<2x8x32xf32>
    %cst_19 = arith.constant 0.000000e+00 : f32
    %17 = vector.broadcast %cst_19 : f32 to vector<2x8x32xf32>
    %18 = arith.maximumf %16, %17 : vector<2x8x32xf32>
    %c2 = arith.constant 2 : index
    %c0_20 = arith.constant 0 : index
    %c0_21 = arith.constant 0 : index
    %c0_22 = arith.constant 0 : index
    %19 = vector.load %arg1[%c2, %c0_20, %c0_21, %c0_22] : memref<3x2x32x32xf32, #tpu.memory_space<vmem>>, vector<1x2x32x32xf32>
    %20 = vector.shape_cast %19 : vector<1x2x32x32xf32> to vector<2x32x32xf32>
    "tpu.trace_start"() <{level = 10 : i32, message = "ebi,eio->ebo"}> : () -> ()
    %cst_23 = arith.constant dense<0.000000e+00> : vector<2x8x32xf32>
    %21 = tpu.matmul %18, %20, %cst_23 {dimension_numbers = #tpu.dot_dimension_numbers<[2], [1], [1], [2], [0, 0, 0, 1, 1, 2], [0], [0]>} : vector<2x8x32xf32>, vector<2x32x32xf32>, vector<2x8x32xf32> -> vector<2x8x32xf32>
    "tpu.trace_stop"() : () -> ()
    %c2_24 = arith.constant 2 : index
    %c0_25 = arith.constant 0 : index
    %c0_26 = arith.constant 0 : index
    %c0_27 = arith.constant 0 : index
    %22 = vector.load %arg2[%c2_24, %c0_25, %c0_26, %c0_27] : memref<3x2x1x32xf32, #tpu.memory_space<vmem>>, vector<1x2x1x32xf32>
    %23 = vector.shape_cast %22 : vector<1x2x1x32xf32> to vector<2x1x32xf32>
    %24 = vector.broadcast %23 : vector<2x1x32xf32> to vector<2x8x32xf32>
    %25 = arith.addf %21, %24 : vector<2x8x32xf32>
    %cst_28 = arith.constant dense<0.000000e+00> : vector<2x8xf32>
    %26 = vector.multi_reduction <add>, %25, %cst_28 [2] : vector<2x8x32xf32> to vector<2x8xf32>
    %c0_29 = arith.constant 0 : index
    %c0_30 = arith.constant 0 : index
    %27 = vector.load %arg3[%c0_29, %c0_30] : memref<2x8xf32, #tpu.memory_space<vmem>>, vector<2x8xf32>
    tpu.vector_store %arg3[%c0_29, %c0_30], %26 {strides = array<i32>} : memref<2x8xf32, #tpu.memory_space<vmem>>, vector<2x8xf32>,
    return
  }
}

</mosaic_0001>

<bundles_post_ra>
// kernel: tpu_custom_call.1
= control target key start
LH: loop header
LB: loop body
LE: loop exit
PB: predicated region body
PF: predicated region fallthrough
CT: control target
= control target key end

     0   :  { %8 = vsyncpa [#allocation3], 0  ;;  %s939_s0 = inlined_call_operand.hbm [shape: f32[2,8,32], index: 0, kind: input, shape index: {}]   ;;  %s940_s1 = inlined_call_operand.hbm [shape: f32[3,2,32,32], index: 1, kind: input, shape index: {}]   ;;  %s941_s2 = inlined_call_operand.vmem [shape: f32[3,2,1,32], index: 2, kind: input, shape index: {}]   ;;  %s942_s3 = inlined_call_operand.hbm [shape: f32[2,8], index: 3, kind: output, shape index: {}]  }
   0x1   :  { %9 = vsyncpa [#allocation6], 0 }
   0x2   :  { %10 = vsyncpa [#allocation4], 0  ;;  %s825_s12 = smov [#allocation2]   ;;  %s753_s16 = scalar_lea.hbm %s939_s0, 256 }
   0x3   :  { %s16_s13 = sshll.u32 %s825_s12, 4  ;;  %p754_p0 = scmp.ne.s32.totalorder %s939_s0, %s753_s16  ;;  %s17_s13 = int_to_ptr.vmem [resolvable:$true] %s16_s13 }
   0x4   :  { %p757_p1 = scmp.lt.u32.totalorder %s753_s16, %s939_s0 }
   0x6   :  { %p759_p2 = pnand %p757_p1, %p754_p0 }
   0x8   :  { %762 = shalt.err (!%p759_p2)
}
   0x9   :  { %s763_s21 = scalar_lea.vmem %s17_s13, 256  ;;  %p768_p4 = scmp.lt.s32.totalorder %s17_s13, %s17_s13 }
   0xa   :  { %p764_p3 = scmp.ne.s32.totalorder %s17_s13, %s763_s21  ;;  %p769_p5 = scmp.lt.s32.totalorder %s763_s21, %s763_s21 }
   0xc   :  { %p770_p6 = por %p769_p5, %p768_p4 }
   0xe   :  { %p771_p7 = pnand %p770_p6, %p764_p3 }
  0x10   :  { %774 = shalt.err (!%p771_p7)
}
  0x11   :  { %s826_s22 = smov 128   ;;  %s827_s23 = smov 8  }
  0x12   :  { %22 = dma.hbm_to_vmem [thread:$0]  %s939_s0, 256, %s17_s13, [#allocation3], %s826_s22, %s826_s22, %s827_s23  }
  0x13   :  { %s828_s26 = smov [#allocation5]   ;;  %s775_s30 = scalar_lea.hbm %s940_s1, 3072 }
  0x14   :  { %s28_s27 = sshll.u32 %s828_s26, 4  ;;  %p776_p8 = scmp.ne.s32.totalorder %s940_s1, %s775_s30  ;;  %s29_s27 = int_to_ptr.vmem [resolvable:$true] %s28_s27 }
  0x15   :  { %p779_p9 = scmp.lt.u32.totalorder %s775_s30, %s940_s1 }
  0x17   :  { %p781_p10 = pnand %p779_p9, %p776_p8 }
  0x19   :  { %784 = shalt.err (!%p781_p10)
}
  0x1a   :  { %s785_s8 = scalar_lea.vmem %s29_s27, 3072  ;;  %p790_p12 = scmp.lt.s32.totalorder %s29_s27, %s29_s27 }
  0x1b   :  { %p786_p11 = scmp.ne.s32.totalorder %s29_s27, %s785_s8  ;;  %p791_p13 = scmp.lt.s32.totalorder %s785_s8, %s785_s8 }
  0x1d   :  { %p792_p0 = por %p791_p13, %p790_p12 }
  0x1f   :  { %p793_p1 = pnand %p792_p0, %p786_p11 }
  0x21   :  { %796 = shalt.err (!%p793_p1)
}
  0x22   :  { %34 = dma.hbm_to_vmem [thread:$0]  %s940_s1, 3072, %s29_s27, [#allocation6], %s826_s22, %s826_s22, %s827_s23  }
  0x23   :  { %819 = dma.done.wait [#allocation3], 256  }
  0x24   :  { %820 = vsyncadd [#allocation3], 4294967040 }
  0x25   :  { %821 = dma.done.wait [#allocation6], 3072  }
  0x26   :  { %822 = vsyncadd [#allocation6], 4294964224  ;;  %v829_v0 = vmov 0.0|0.0   ;;  %vm830_vm0 = vmmov 0   ;;  %v831_v1 = vmov 0.0   ;;  %v45_v2 = vld [vmem:[#allocation5] sm:$0xff] }
  0x27   :  { %709 = vmatprep.subr.bf16.mxu0 %v829_v0  ;;  %715 = vmatprep.subr.bf16.mxu1 %v829_v0  ;;  %v46_v3 = vld [vmem:[#allocation5 + $0x8] sm:$0xff]  ;;  %v49_v4 = vld [vmem:[#allocation5 + $0x20] sm:$0xff]  ;;  %v47_v7 = vld [vmem:[#allocation5 + $0x10] sm:$0xff]  ;;  %vm67_vm1 = vcmask 261120   ;;  %s832_s21 = smov [#allocation7]   ;;  %vm576_vm2 = vcmask 1041409  }
  0x28   :  { %651 = vmatprep.mubr.msk.f32.mxu0 %vm830_vm0, %v831_v1  ;;  %662 = vmatprep.mubr.msk.f32.mxu1 %vm830_vm0, %v831_v1  ;;  %v710_v5 = vpack.c.bf16 %v46_v3, %v45_v2  ;;  %v50_v6 = vld [vmem:[#allocation5 + $0x28] sm:$0xff]  ;;  %v48_v8 = vld [vmem:[#allocation5 + $0x18] sm:$0xff]  ;;  %v51_v10 = vld [vmem:[#allocation5 + $0x30] sm:$0xff]  ;;  %s587_s22 = sshll.u32 %s832_s21, 4  ;;  %vm579_vm3 = vcmask 58368   ;;  %s588_s22 = int_to_ptr.vmem [resolvable:$true] %s587_s22 }
  0x29   :  { %v716_v9 = vpack.c.bf16 %v50_v6, %v49_v4  ;;  %v52_v11 = vld [vmem:[#allocation5 + $0x38] sm:$0xff]  ;;  %v713_v12 = vpack.c.bf16 %v48_v8, %v47_v7  ;;  %v217_v14 = vld [vmem:[#allocation5 + $0x40] sm:$0xff]  ;;  %v218_v15 = vld [vmem:[#allocation5 + $0x48] sm:$0xff]  ;;  %v566_v6 = vlaneseq  ;;  %p802_p3 = scmp.lt.s32.totalorder %s588_s22, %s588_s22 }
  0x2a   :  { %711 = vmatpush3.bf16.msra.mxu0 %v710_v5  ;;  %v719_v13 = vpack.c.bf16 %v52_v11, %v51_v10  ;;  %v43_v16 = vld [vmem:[#allocation2] sm:$0xff]  ;;  %v722_v17 = vpack.c.bf16 %v218_v15, %v217_v14  ;;  %v44_v18 = vld [vmem:[#allocation2 + $0x8] sm:$0xff]  ;;  %v221_v19 = vld [vmem:[#allocation5 + $0x60] sm:$0xff] }
  0x2b   :  { %712 = vmatprep.subr.bf16.mxu0 %v829_v0  ;;  %717 = vmatpush3.bf16.msra.mxu1 %v716_v9  ;;  %v222_v20 = vld [vmem:[#allocation5 + $0x68] sm:$0xff]  ;;  %v219_v22 = vld [vmem:[#allocation5 + $0x50] sm:$0xff]  ;;  %v220_v23 = vld [vmem:[#allocation5 + $0x58] sm:$0xff]  ;;  %v567_v7 = vand.u32 127, %v566_v6  ;;  %v569_v8 = vshrl.u32 %v566_v6, 7 }
  0x2c   :  { %718 = vmatprep.subr.bf16.mxu1 %v829_v0  ;;  %v728_v21 = vpack.c.bf16 %v222_v20, %v221_v19  ;;  %v725_v24 = vpack.c.bf16 %v220_v23, %v219_v22  ;;  %v223_v25 = vld [vmem:[#allocation5 + $0x70] sm:$0xff]  ;;  %v224_v26 = vld [vmem:[#allocation5 + $0x78] sm:$0xff]  ;;  %v389_v30 = vld [vmem:[#allocation5 + $0x80] sm:$0xff] }
  0x2d   :  { %v731_v27 = vpack.c.bf16 %v224_v26, %v223_v25  ;;  %v597_v28 = vld [vmem:[%s941_s2] ss:$0 sm:$0xff]  ;;  %v598_v29 = vld [vmem:[%s941_s2 + $0x1] ss:$0 sm:$0xff]  ;;  %v390_v31 = vld [vmem:[#allocation5 + $0x88] sm:$0xff]  ;;  %v570_v10 = vsub.s32 %v567_v7, %v569_v8 }
  0x2e   :  { %714 = vmatpush3.bf16.msra.mxu0 %v713_v12  ;;  %v734_v38 = vpack.c.bf16 %v390_v31, %v389_v30  ;;  %v393_v41 = vld [vmem:[#allocation5 + $0xa0] sm:$0xff]  ;;  %v394_v42 = vld [vmem:[#allocation5 + $0xa8] sm:$0xff]  ;;  %v391_v44 = vld [vmem:[#allocation5 + $0x90] sm:$0xff] }
  0x2f   :  { %720 = vmatpush3.bf16.msra.mxu1 %v719_v13  ;;  %721 = vmatprep.subr.bf16.mxu0 %v829_v0  ;;  %v740_v43 = vpack.c.bf16 %v394_v42, %v393_v41  ;;  %v392_v45 = vld [vmem:[#allocation5 + $0x98] sm:$0xff]  ;;  %v395_v47 = vld [vmem:[#allocation5 + $0xb0] sm:$0xff] }
  0x30   :  { %727 = vmatprep.subr.bf16.mxu1 %v829_v0  ;;  %v737_v46 = vpack.c.bf16 %v392_v45, %v391_v44  ;;  %v396_v48 = vld [vmem:[#allocation5 + $0xb8] sm:$0xff]  ;;  %v603_v50 = vld [vmem:[%s941_s2 + $0x2] ss:$0 sm:$0xff]  ;;  %v604_v51 = vld [vmem:[%s941_s2 + $0x3] ss:$0 sm:$0xff] }
  0x31   :  { %652 = vmatmul.mubr.msk.f32.vlgmr.msra.gmra.mrb[0].mxu0 %vm67_vm1, %v43_v16  ;;  %v743_v49 = vpack.c.bf16 %v396_v48, %v395_v47  ;;  %v609_v60 = vld [vmem:[%s941_s2 + $0x4] ss:$0 sm:$0xff]  ;;  %v610_v61 = vld [vmem:[%s941_s2 + $0x5] ss:$0 sm:$0xff]  ;;  %s797_s2 = scalar_lea.vmem %s588_s22, 32 }
  0x32   :  { %663 = vmatmul.mubr.msk.f32.vlgmr.msra.gmra.mrb[0].mxu1 %vm67_vm1, %v44_v18  ;;  %723 = vmatpush3.bf16.msra.mxu0 %v722_v17  ;;  %p798_p2 = scmp.ne.s32.totalorder %s588_s22, %s797_s2  ;;  %p803_p4 = scmp.lt.s32.totalorder %s797_s2, %s797_s2 }
  0x33   :  { %724 = vmatprep.subr.bf16.mxu0 %v829_v0  ;;  %673 = vmatprep.mubr.msk.f32.mxu0 %vm830_vm0, %v831_v1 }
  0x34   :  { %684 = vmatprep.mubr.msk.f32.mxu1 %vm830_vm0, %v831_v1  ;;  %729 = vmatpush3.bf16.msra.mxu1 %v728_v21  ;;  %p804_p5 = por %p803_p4, %p802_p3 }
  0x35   :  { %730 = vmatprep.subr.bf16.mxu1 %v829_v0 }
  0x36   :  { %726 = vmatpush3.bf16.msra.mxu0 %v725_v24  ;;  %p805_p6 = pnand %p804_p5, %p798_p2 }
  0x37   :  { %733 = vmatprep.subr.bf16.mxu0 %v829_v0 }
  0x38   :  { %732 = vmatpush3.bf16.msra.mxu1 %v731_v27 }
  0x39   :  { %739 = vmatprep.subr.bf16.mxu1 %v829_v0 }
 0x104   :  { %v137_v32 = vpop.f32.mrb[0].mxu0 }
 0x105   :  { %v138_v33 = vadd.f32 %v597_v28, %v137_v32  ;;  %v653_v34 = vpop.f32.mrb[1].mxu0  ;;  %v210_v35 = vpop.f32.mrb[0].mxu1 }
 0x106   :  { %v211_v36 = vadd.f32 %v598_v29, %v210_v35  ;;  %v664_v37 = vpop.f32.mrb[1].mxu1 }
 0x107   :  { %v214_v39 = vmax.f32 %v138_v33, 0.0 }
 0x108   :  { %v215_v40 = vmax.f32 %v211_v36, 0.0 }
 0x109   :  { %674 = vmatmul.mubr.msk.f32.vlgmr.msra.gmra.mrb[2].mxu0 %vm67_vm1, %v214_v39 }
 0x10a   :  { %685 = vmatmul.mubr.msk.f32.vlgmr.msra.gmra.mrb[2].mxu1 %vm67_vm1, %v215_v40  ;;  %735 = vmatpush3.bf16.msra.mxu0 %v734_v38 }
 0x10b   :  { %736 = vmatprep.subr.bf16.mxu0 %v829_v0  ;;  %695 = vmatprep.mubr.msk.f32.mxu0 %vm830_vm0, %v831_v1 }
 0x10c   :  { %706 = vmatprep.mubr.msk.f32.mxu1 %vm830_vm0, %v831_v1  ;;  %741 = vmatpush3.bf16.msra.mxu1 %v740_v43 }
 0x10d   :  { %742 = vmatprep.subr.bf16.mxu1 %v829_v0 }
 0x10e   :  { %738 = vmatpush3.bf16.msra.mxu0 %v737_v46 }
 0x110   :  { %744 = vmatpush3.bf16.msra.mxu1 %v743_v49 }
 0x1dc   :  { %v309_v52 = vpop.f32.mrb[2].mxu0 }
 0x1dd   :  { %v310_v53 = vadd.f32 %v603_v50, %v309_v52  ;;  %v675_v54 = vpop.f32.mrb[3].mxu0  ;;  %v382_v55 = vpop.f32.mrb[2].mxu1 }
 0x1de   :  { %v383_v56 = vadd.f32 %v604_v51, %v382_v55  ;;  %v686_v57 = vpop.f32.mrb[3].mxu1 }
 0x1df   :  { %v386_v58 = vmax.f32 %v310_v53, 0.0 }
 0x1e0   :  { %v387_v59 = vmax.f32 %v383_v56, 0.0 }
 0x1e1   :  { %696 = vmatmul.mubr.msk.f32.vlgmr.msra.gmra.mrb[4].mxu0 %vm67_vm1, %v386_v58 }
 0x1e2   :  { %707 = vmatmul.mubr.msk.f32.vlgmr.msra.gmra.mrb[4].mxu1 %vm67_vm1, %v387_v59 }
 0x2b4   :  { %v481_v62 = vpop.f32.mrb[4].mxu0 }
 0x2b5   :  { %v482_v63 = vadd.f32 %v609_v60, %v481_v62  ;;  %v697_v0 = vpop.f32.mrb[5].mxu0  ;;  %v554_v1 = vpop.f32.mrb[4].mxu1 }
 0x2b6   :  { %v555_v2 = vadd.f32 %v610_v61, %v554_v1  ;;  %v708_v3 = vpop.f32.mrb[5].mxu1 }
 0x2b7   :  { %v558_v4 = vsel %vm67_vm1, %v482_v63, 0.0 }
 0x2b8   :  { %559 = vadd.xlane.f32.xlu0 %v558_v4  ;;  %v561_v5 = vsel %vm67_vm1, %v555_v2, 0.0 }
 0x2bc   :  { %562 = vadd.xlane.f32.xlu0 %v561_v5 }
 0x345   :  { %v560_v9 = vpop.xlane.xlu0 %559 }
 0x346   :  { %v571_v12 = vrot.slane %v560_v9, %v570_v10 }
 0x349   :  { %v563_v11 = vpop.xlane.xlu0 %562 }
 0x34a   :  { %v575_v13 = vrot.slane %v563_v11, %v570_v10 }
 0x34c   :  { %v577_v14 = vsel %vm576_vm2, %v575_v13, %v571_v12 }
 0x34d   :  { %580 = vst.msk [vmem:[#allocation7] sm:$0x3] %vm579_vm3, %v577_v14 }
 0x34e   :  { %808 = shalt.err (!%p805_p6)
}
 0x34f   :  { %s809_s25 = scalar_lea.hbm %s942_s3, 32 }
 0x350   :  { %p810_p7 = scmp.ne.s32.totalorder %s942_s3, %s809_s25  ;;  %p813_p8 = scmp.lt.u32.totalorder %s809_s25, %s942_s3 }
 0x352   :  { %p815_p9 = pnand %p813_p8, %p810_p7 }
 0x354   :  { %818 = shalt.err (!%p815_p9)
}
 0x355   :  { %590 = dma.vmem_to_hbm [thread:$0]  %s588_s22, 32, %s942_s3, [#allocation4]  }
 0x356   :  { %823 = dma.done.wait [#allocation4], 32  }
 0x357   :  { %824 = vsyncadd [#allocation4], 4294967264 }
 0x358   :  { %594 = vsyncpa [#allocation3], 1 }
 0x359   :  { %595 = vsyncpa [#allocation6], 1 }
 0x35a   :  { %596 = vsyncpa [#allocation4], 1 }

</bundles_post_ra>
